<compile_context>
chip_gen: v7x
topology: tpu7x:2x2x1
jax: 0.10.0
libtpu: 0.0.40
codegen_flags: <defaults>
</compile_context>

<pallas_src>
import math

import jax
import jax.numpy as jnp
from jax.experimental import pallas as pl
from jax.experimental.pallas import tpu as pltpu


def make_positional_encoding(max_len, embed_dim):
    """Exactly mirrors the PyTorch registered-buffer construction (f32)."""
    assert embed_dim % 2 == 0, "PositionalEncoding requires an even embed_dim"
    position = jnp.arange(max_len, dtype=jnp.float32)[:, None]               # (max_len, 1)
    div_term = jnp.exp(jnp.arange(0, embed_dim, 2, dtype=jnp.float32)
                       * (-math.log(10000.0) / embed_dim))                   # (E//2,)
    pe = jnp.zeros((max_len, embed_dim), jnp.float32)
    pe = pe.at[:, 0::2].set(jnp.sin(position * div_term))
    pe = pe.at[:, 1::2].set(jnp.cos(position * div_term))
    return pe


def _pe_add_kernel(x_ref, pe_ref, o_ref):
    # x_ref / o_ref: (tl, E) in the caller's dtype (batch dim squeezed); pe_ref: (tl, E) f32.
    # Add in f32, cast on store -> output preserves the input dtype like the PyTorch module.
    o_ref[...] = (x_ref[...].astype(jnp.float32) + pe_ref[...]).astype(o_ref.dtype)


def positional_encoding_forward(x, pe, *, block_rows=1024):
    """x: (B, L, E) any float dtype, pe: (max_len, E) f32.

    Returns x + pe[:L] in x's dtype (dropout = identity / eval mode).
    """
    B, L, E = x.shape
    dtype = x.dtype
    pe_l = pe[:L].astype(jnp.float32)                                        # (L, E)

    itemsize = jnp.dtype(dtype).itemsize
    # Sublane alignment for the row tile: 8 rows per vreg at 32-bit, 16 at 16-bit, 32 at 8-bit.
    sublane = 8 * max(1, 4 // max(1, itemsize))

    # Cap the row tile so double-buffered x, out (native dtype) and pe (f32) stay
    # comfortably under v5e's 16 MiB default scoped VMEM (v6e/v7x have >= 32 MiB scoped).
    bytes_per_row = E * (2 * itemsize + 2 * itemsize + 2 * 4)   # 2-buf x + 2-buf out + 2-buf pe
    vmem_budget = 12 << 20
    max_rows = max(sublane, vmem_budget // max(1, bytes_per_row))

    tl = min(block_rows, max_rows, L)
    if tl < L:
        # Align to the dtype's sublane packing; ragged last block is masked by Pallas.
        tl = max(sublane, (tl // sublane) * sublane)
    num_l = pl.cdiv(L, tl)

    # Grid: seq blocks OUTER, batch INNER -> pe's block index is constant across the
    # fast-varying batch axis, so its tile stays resident instead of being re-DMA'd.
    grid = (num_l, B)

    # NOTE: if x is dead after this op, callers can pass input_output_aliases={0: 0}
    # to pl.pallas_call to do the add in place (halves the HBM footprint, not traffic).
    return pl.pallas_call(
        _pe_add_kernel,
        out_shape=jax.ShapeDtypeStruct((B, L, E), dtype),
        grid=grid,
        in_specs=[
            pl.BlockSpec((pl.Squeezed(), tl, E), lambda l, b: (b, l, 0)),  # x
            pl.BlockSpec((tl, E), lambda l, b: (l, 0)),                    # pe (batch-invariant)
        ],
        out_specs=pl.BlockSpec((pl.Squeezed(), tl, E), lambda l, b: (b, l, 0)),
        compiler_params=pltpu.CompilerParams(
            dimension_semantics=("parallel", "parallel")),
    )(x, pe_l)


if __name__ == "__main__":
    # Small, lane-dense config: E=128 (full 128-lane vreg), L a multiple of 8/16 sublanes.
    B, L, E = 4, 64, 128
    MAX_LEN = 512

    key = jax.random.PRNGKey(0)
    pe = make_positional_encoding(MAX_LEN, E)

    # ---- f32 path (tight numerical check against the reference) ----
    x32 = jax.random.normal(key, (B, L, E), dtype=jnp.float32)
    out32 = jax.block_until_ready(positional_encoding_forward(x32, pe))
    ref32 = x32 + pe[:L][None, :, :]
    assert out32.shape == (B, L, E) and out32.dtype == jnp.float32
    assert bool(jnp.all(jnp.isfinite(out32)))
    assert bool(jnp.allclose(out32, ref32, rtol=1e-6, atol=1e-6)), \
        float(jnp.max(jnp.abs(out32 - ref32)))

    # ---- bf16 path (native-dtype I/O: output keeps the input dtype) ----
    xbf = x32.astype(jnp.bfloat16)
    outbf = jax.block_until_ready(positional_encoding_forward(xbf, pe))
    refbf = (xbf.astype(jnp.float32) + pe[:L][None, :, :]).astype(jnp.bfloat16)
    assert outbf.shape == (B, L, E) and outbf.dtype == jnp.bfloat16
    assert bool(jnp.allclose(outbf.astype(jnp.float32), refbf.astype(jnp.float32),
                             rtol=2e-2, atol=2e-2))

    print("KERNEL_OK")
</pallas_src>

<mosaic_0001>
module attributes {stable_mosaic.version = 11 : i64} {
  func.func @_pe_add_kernel(%arg0: i32, %arg1: i32, %arg2: memref<1x64x128xf32, #tpu.memory_space<vmem>>, %arg3: memref<64x128xf32, #tpu.memory_space<vmem>>, %arg4: memref<1x64x128xf32, #tpu.memory_space<vmem>>) attributes {dimension_semantics = [#tpu.dimension_semantics<parallel>, #tpu.dimension_semantics<parallel>], iteration_bounds = array<i64: 1, 4>, scalar_prefetch = 0 : i64, scratch_operands = 0 : i64, tpu.core_type = #tpu.core_type<tc>, window_params = [{transform_indices = @transform_0, window_bounds = array<i64: 1, 64, 128>}, {transform_indices = @transform_1, window_bounds = array<i64: 64, 128>}, {transform_indices = @transform_2, window_bounds = array<i64: 1, 64, 128>}]} {
    %c0 = arith.constant 0 : index
    %c0_0 = arith.constant 0 : index
    %c0_1 = arith.constant 0 : index
    %0 = vector.load %arg2[%c0, %c0_0, %c0_1] : memref<1x64x128xf32, #tpu.memory_space<vmem>>, vector<1x64x128xf32>
    %1 = vector.shape_cast %0 : vector<1x64x128xf32> to vector<64x128xf32>
    %c0_2 = arith.constant 0 : index
    %c0_3 = arith.constant 0 : index
    %2 = vector.load %arg3[%c0_2, %c0_3] : memref<64x128xf32, #tpu.memory_space<vmem>>, vector<64x128xf32>
    %3 = arith.addf %1, %2 : vector<64x128xf32>
    %c0_4 = arith.constant 0 : index
    %c0_5 = arith.constant 0 : index
    %c0_6 = arith.constant 0 : index
    %4 = vector.load %arg4[%c0_4, %c0_5, %c0_6] : memref<1x64x128xf32, #tpu.memory_space<vmem>>, vector<1x64x128xf32>
    %5 = vector.shape_cast %4 : vector<1x64x128xf32> to vector<64x128xf32>
    %6 = vector.shape_cast %3 : vector<64x128xf32> to vector<1x64x128xf32>
    tpu.vector_store %arg4[%c0_4, %c0_5, %c0_6], %6 {strides = array<i32>} : memref<1x64x128xf32, #tpu.memory_space<vmem>>, vector<1x64x128xf32>,
    return
  }
  func.func @transform_0(%arg0: i32, %arg1: i32) -> (i32, i32, i32) {
    %c0_i32 = arith.constant 0 : i32
    %c0_i32_0 = arith.constant 0 : i32
    return %arg1, %arg0, %c0_i32 : i32, i32, i32
  }
  func.func @transform_1(%arg0: i32, %arg1: i32) -> (i32, i32) {
    %c0_i32 = arith.constant 0 : i32
    %c0_i32_0 = arith.constant 0 : i32
    return %arg0, %c0_i32 : i32, i32
  }
  func.func @transform_2(%arg0: i32, %arg1: i32) -> (i32, i32, i32) {
    %c0_i32 = arith.constant 0 : i32
    %c0_i32_0 = arith.constant 0 : i32
    return %arg1, %arg0, %c0_i32 : i32, i32, i32
  }
}

</mosaic_0001>

<bundles_post_ra>
// kernel: tpu_custom_call.1
= control target key start
LH: loop header
LB: loop body
LE: loop exit
PB: predicated region body
PF: predicated region fallthrough
CT: control target
= control target key end

     0   :  { %7 = vsyncpa [#allocation3], 0  ;;  %s850_s0 = inlined_call_operand.hbm [shape: f32[4,64,128], index: 0, kind: input, shape index: {}]   ;;  %s851_s1 = inlined_call_operand.hbm [shape: f32[64,128], index: 1, kind: input, shape index: {}]   ;;  %s852_s2 = inlined_call_operand.hbm [shape: f32[4,64,128], index: 2, kind: output, shape index: {}]  }
   0x1   :  { %9 = vsyncpa [#allocation3 + $0x1], 0 }
   0x2   :  { %10 = vsyncpa [#allocation6], 0 }
   0x3   :  { %11 = vsyncpa [#allocation4], 0 }
   0x4   :  { %13 = vsyncpa [#allocation4 + $0x1], 0  ;;  %s617_s9 = smov 0   ;;  %s619_s10 = smov 0  }
   0x5   :  { %s621_s11 = smov 0   ;;  %s623_s12 = smov 0  }
   0x6   :  { %s625_s13 = smov 0   ;;  %s627_s14 = smov 0  }
   0x7 LB: > { %s353_s15 = sadd.s32 4294967295, %s593_s14   ;;  %s354_s16 = sadd.s32 4294967294, %s593_s14   ;;  %s593_s14 = sphi %s627_s14, %s19_s14   ;;  %s589_s13 = sphi %s625_s13, %s875_s13   ;;  %s585_s12 = sphi %s623_s12, %s874_s12   ;;  %s581_s11 = sphi %s621_s11, %s873_s11   ;;  %s577_s10 = sphi %s619_s10, %s872_s10   ;;  %s573_s9 = sphi %s617_s9, %s871_s9  }
   0x8   : > { %p53_p0 = scmp.ne.s32.totalorder %s577_s10, %s573_s9  ;;  %p651_p1 = scmp.eq.s32.totalorder %s353_s15, 0 }
   0x9   : > { %p655_p2 = scmp.eq.s32.totalorder %s353_s15, 3  ;;  %p111_p3 = scmp.eq.s32.totalorder %s354_s16, 3 }
   0xa   : > { %s857_s17 = scalar_select %p651_p1, 1, 0 }
   0xb   : > { %s858_s18 = scalar_select %p655_p2, 1, 0 }
   0xc   : > { %p661_p4 = por %p651_p1, %p53_p0  ;;  %p355_p5 = scmp.ge.s32.totalorder %s593_s14, 1 }
   0xd   : > { %p666_p6 = por %p111_p3, %p53_p0  ;;  %p118_p7 = scmp.lt.s32.totalorder %s593_s14, 5 }
   0xe   : > { %s859_s19 = scalar_select %p661_p4, 1, 0 }
   0xf   : > { %s860_s20 = scalar_select %p666_p6, 1, 0 }
  0x10   : > { %p671_p8 = pnand %p355_p5, %p118_p7  ;;  %s595_s22 = smov [#allocation5]  }
  0x11   : > { %s133_s23 = sshll.u32 %s595_s22, 4  ;;  %s28_s25 = sadd.s32 1, %s589_s13  ;;  %s134_s23 = int_to_ptr.vmem [resolvable:$true] %s133_s23 }
  0x12   : > { %s861_s21 = scalar_select %p671_p8, 1, 0 }
  0x13   : > { %p380_p9 = pneg %p671_p8  ;;  %s449_s28 = scalar_lea.hbm %s851_s1, 1024 }
  0x14   : > { %p450_p11 = scmp.ne.s32.totalorder %s851_s1, %s449_s28  ;;  %p456_p3 = scmp.lt.u32.totalorder %s449_s28, %s851_s1 }
  0x15   : > { %p679_p10 = pnand %p380_p9, %p651_p1 }
  0x17   : > { %p451_p12 = pneg %p679_p10 }
  0x19   : > { %p452_p13 = pnand %p451_p12, %p450_p11 }
  0x1b   : > { %p453_p0 = pneg %p452_p13 }
  0x1d   : > { %p458_p5 = pnand %p456_p3, %p453_p0 }
  0x1f   : > { %461 = shalt.err (!%p458_p5)
}
  0x20   : > { %s462_s5 = scalar_lea.vmem %s134_s23, 1024  ;;  %p470_p1 = scmp.lt.s32.totalorder %s134_s23, %s134_s23 }
  0x21   : > { %p463_p7 = scmp.ne.s32.totalorder %s134_s23, %s462_s5  ;;  %p471_p4 = scmp.lt.s32.totalorder %s462_s5, %s462_s5 }
  0x23   : > { %p465_p9 = pnand %p463_p7, %p451_p12  ;;  %p472_p8 = por %p471_p4, %p470_p1 }
  0x25   : > { %p466_p6 = pneg %p465_p9 }
  0x27   : > { %p473_p2 = pnand %p472_p8, %p466_p6 }
  0x29   : > { %476 = shalt.err (!%p473_p2)
}
  0x2a   : > { %s596_s6 = smov 128   ;;  %s597_s7 = smov 8  }
  0x2b   : > { %383 = dma.hbm_to_vmem [thread:$0]  (!%p679_p10), %s851_s1, 1024, %s134_s23, [#allocation6], %s596_s6, %s596_s6, %s597_s7  }
  0x2c   : > { %p29_p1 = scmp.ge.s32.totalorder %s28_s25, 4  ;;  %s40_s16 = sadd.s32 1, %s581_s11 }
  0x2d   : > { %p47_p2 = scmp.ne.s32.totalorder %s581_s11, %s577_s10  ;;  %p48_p4 = scmp.eq.s32.totalorder %s593_s14, 0 }
  0x2e   : > { %s877_s25 = smov (%p29_p1, %s28_s25), 0  ;;  %p864_p8 = scmp.ne.s32.totalorder %s858_s18, 0 }
  0x2f   : > { %p709_p6 = por %p48_p4, %p47_p2  ;;  %s35_s26 = ssub.s32 %s589_s13, %s877_s25 }
  0x30   : > { %p715_p11 = por %p864_p8, %p47_p2  ;;  %p393_p12 = scmp.lt.s32.totalorder %s593_s14, 4 }
  0x31   : > { %p38_p10 = scmp.eq.s32.totalorder %s35_s26, 0  ;;  %s147_s23 = sand.u32 1, %s581_s11  }
  0x32   : > { %s358_s27 = sshll.u32 %s147_s23, 6  ;;  %s370_s29 = sshll.u32 %s589_s13, 10 }
  0x33   : > { %s724_s28 = scalar_select %p38_p10, %s581_s11, %s40_s16  }
  0x34   : > { %s730_s4 = scalar_lea.hbm %s850_s0, %s370_s29  ;;  %s151_s18 = scalar_lea.vmem [#allocation2], %s358_s27 }
  0x35   : > { %s160_s5 = sshll.u32 %s151_s18, 4  ;;  %p736_p13 = pnand %p393_p12, %p709_p6  ;;  %s732_s5 = int_to_ptr.vmem [resolvable:$true] %s160_s5 }
  0x36   : > { %s740_s15 = scalar_lea.sflag [#allocation3], %s147_s23  ;;  %s477_s16 = scalar_lea.hbm %s730_s4, 1024 }
  0x37   : > { %p478_p0 = scmp.ne.s32.totalorder %s730_s4, %s477_s16  ;;  %p479_p3 = pneg %p736_p13 }
  0x38   : > { %s482_s22 = scalar_lea.hbm %s850_s0, 4096  ;;  %p483_p9 = scmp.lt.u32.totalorder %s730_s4, %s850_s0 }
  0x39   : > { %p480_p5 = pnand %p479_p3, %p478_p0  ;;  %p484_p1 = scmp.lt.u32.totalorder %s482_s22, %s477_s16 }
  0x3a   : > { %p486_p4 = scmp.lt.u32.totalorder %s477_s16, %s730_s4 }
  0x3b   : > { %p481_p7 = pneg %p480_p5  ;;  %p485_p2 = por %p484_p1, %p483_p9 }
  0x3d   : > { %p487_p6 = por %p486_p4, %p485_p2 }
  0x3f   : > { %p488_p8 = pnand %p487_p6, %p481_p7 }
  0x41   : > { %491 = shalt.err (!%p488_p8)
}
  0x42   : > { %s492_s23 = scalar_lea.vmem %s732_s5, 1024  ;;  %s598_s3 = smov [#allocation2]  }
  0x43   : > { %p493_p12 = scmp.ne.s32.totalorder %s732_s5, %s492_s23  ;;  %s497_s18 = sshll.u32 %s598_s3, 4  ;;  %s498_s18 = int_to_ptr.vmem [resolvable:$false] %s497_s18 }
  0x44   : > { %s499_s26 = scalar_lea.vmem %s498_s18, 2048  ;;  %p500_p5 = scmp.lt.s32.totalorder %s732_s5, %s498_s18 }
  0x45   : > { %p495_p10 = pnand %p493_p12, %p479_p3  ;;  %p501_p9 = scmp.lt.s32.totalorder %s499_s26, %s492_s23 }
  0x47   : > { %p496_p0 = pneg %p495_p10  ;;  %p502_p1 = por %p501_p9, %p500_p5 }
  0x49   : > { %p503_p2 = pnand %p502_p1, %p496_p0 }
  0x4b   : > { %506 = shalt.err (!%p503_p2)
}
  0x4c   : > { %387 = dma.hbm_to_vmem [thread:$0]  (!%p736_p13), %s730_s4, 1024, %s732_s5, %s740_s15, %s596_s6, %s596_s6, %s597_s7  }
  0x4d   : > { %p867_p3 = scmp.ne.s32.totalorder %s861_s21, 0 }
  0x4e   : > { %s774_s16 = sand.u32 (!%p867_p3), 1, %s577_s10   ;;  %p868_p7 = scmp.ne.s32.totalorder (!%p867_p3), %s859_s19, 0 }
  0x4f   : > { %172 = sbr.rel (%p867_p3) target bundleno = 116 (0x74), region = 28  ;;  %s362_s27 = sshll.u32 (!%p867_p3), %s774_s16, 6 }
  0x50   : > { %s175_s22 = scalar_lea.sflag (!%p867_p3), [#allocation3], %s774_s16  ;;  %s778_s29 = scalar_lea.vmem (!%p867_p3), [#allocation2], %s362_s27 }
  0x56   : > { %560 = dma.done.wait (%p868_p7), %s175_s22, 1024  }
  0x57   : > { %562 = vsyncadd (%p868_p7), %s175_s22, 4294966272  ;;  %p869_p13 = scmp.ne.s32.totalorder %s857_s17, 0 }
  0x59   : > { %564 = dma.done.wait (%p869_p13), [#allocation6], 1024  }
  0x5a   : > { %566 = vsyncadd (%p869_p13), [#allocation6], 4294966272  ;;  %v206_v0 = vld [vmem:[%s778_s29] sm:$0xff]  ;;  %v207_v2 = vld [vmem:[%s778_s29 + $0x8] sm:$0xff]  ;;  %s202_s19 = scalar_lea.vmem [#allocation7], %s362_s27  ;;  %s371_s17 = sshll.u32 %s585_s12, 10 }
  0x5b   : > { %v214_v1 = vld [vmem:[#allocation5] sm:$0xff]  ;;  %v215_v4 = vld [vmem:[#allocation5 + $0x8] sm:$0xff]  ;;  %v208_v5 = vld [vmem:[%s778_s29 + $0x10] sm:$0xff]  ;;  %s254_s21 = sshll.u32 %s202_s19, 4  ;;  %s802_s7 = scalar_lea.hbm %s852_s2, %s371_s17  ;;  %s797_s21 = int_to_ptr.vmem [resolvable:$true] %s254_s21 }
  0x5c   : > { %v222_v3 = vadd.f32 %v214_v1, %v206_v0  ;;  %v216_v6 = vld [vmem:[#allocation5 + $0x10] sm:$0xff]  ;;  %v223_v7 = vadd.f32 %v215_v4, %v207_v2  ;;  %v209_v9 = vld [vmem:[%s778_s29 + $0x18] sm:$0xff]  ;;  %v210_v11 = vld [vmem:[%s778_s29 + $0x20] sm:$0xff]  ;;  %s239_s4 = scalar_lea.sflag [#allocation4], %s774_s16  ;;  %s507_s5 = scalar_lea.vmem %s797_s21, 1024 }
  0x5d   : > { %v224_v8 = vadd.f32 %v216_v6, %v208_v5  ;;  %v217_v10 = vld [vmem:[#allocation5 + $0x18] sm:$0xff]  ;;  %v218_v13 = vld [vmem:[#allocation5 + $0x20] sm:$0xff]  ;;  %v211_v14 = vld [vmem:[%s778_s29 + $0x28] sm:$0xff]  ;;  %p508_p4 = scmp.ne.s32.totalorder %s797_s21, %s507_s5  ;;  %s599_s8 = smov [#allocation7]  }
  0x5e   : > { %230 = vst [vmem:[%s202_s19] sm:$0xff] %v222_v3  ;;  %v225_v12 = vadd.f32 %v217_v10, %v209_v9  ;;  %v219_v15 = vld [vmem:[#allocation5 + $0x28] sm:$0xff]  ;;  %231 = vst [vmem:[%s202_s19 + $0x8] sm:$0xff] %v223_v7  ;;  %v226_v16 = vadd.f32 %v218_v13, %v210_v11  ;;  %v212_v18 = vld [vmem:[%s778_s29 + $0x30] sm:$0xff]  ;;  %s511_s15 = sshll.u32 %s599_s8, 4  ;;  %s512_s15 = int_to_ptr.vmem [resolvable:$false] %s511_s15 }
  0x5f   : > { %232 = vst [vmem:[%s202_s19 + $0x10] sm:$0xff] %v224_v8  ;;  %v227_v17 = vadd.f32 %v219_v15, %v211_v14  ;;  %v220_v19 = vld [vmem:[#allocation5 + $0x30] sm:$0xff]  ;;  %v213_v20 = vld [vmem:[%s778_s29 + $0x38] sm:$0xff]  ;;  %p509_p6 = pnand %p508_p4, %p715_p11  ;;  %s513_s30 = scalar_lea.vmem %s512_s15, 2048 }
  0x60   : > { %233 = vst [vmem:[%s202_s19 + $0x18] sm:$0xff] %v225_v12  ;;  %v228_v21 = vadd.f32 %v220_v19, %v212_v18  ;;  %v221_v22 = vld [vmem:[#allocation5 + $0x38] sm:$0xff]  ;;  %234 = vst [vmem:[%s202_s19 + $0x20] sm:$0xff] %v226_v16  ;;  %p514_p12 = scmp.lt.s32.totalorder %s797_s21, %s512_s15  ;;  %p515_p10 = scmp.lt.s32.totalorder %s513_s30, %s507_s5 }
  0x61   : > { %235 = vst [vmem:[%s202_s19 + $0x28] sm:$0xff] %v227_v17  ;;  %v229_v23 = vadd.f32 %v221_v22, %v213_v20  ;;  %p510_p8 = pneg %p509_p6 }
  0x62   : > { %236 = vst [vmem:[%s202_s19 + $0x30] sm:$0xff] %v228_v21  ;;  %p516_p0 = por %p515_p10, %p514_p12 }
  0x63   : > { %237 = vst [vmem:[%s202_s19 + $0x38] sm:$0xff] %v229_v23 }
  0x64   : > { %p517_p5 = pnand %p516_p0, %p510_p8 }
  0x66   : > { %520 = shalt.err (!%p517_p5)
}
  0x67   : > { %s521_s23 = scalar_lea.hbm %s802_s7, 1024  ;;  %s525_s26 = scalar_lea.hbm %s852_s2, 4096 }
  0x68   : > { %p522_p9 = scmp.ne.s32.totalorder %s802_s7, %s521_s23  ;;  %p526_p3 = scmp.lt.u32.totalorder %s802_s7, %s852_s2 }
  0x69   : > { %p527_p7 = scmp.lt.u32.totalorder %s525_s26, %s521_s23  ;;  %p529_p4 = scmp.lt.u32.totalorder %s521_s23, %s802_s7 }
  0x6a   : > { %p523_p1 = pnand %p522_p9, %p715_p11 }
  0x6b   : > { %p528_p13 = por %p527_p7, %p526_p3 }
  0x6c   : > { %p524_p2 = pneg %p523_p1 }
  0x6d   : > { %p530_p6 = por %p529_p4, %p528_p13 }
  0x6f   : > { %p531_p8 = pnand %p530_p6, %p524_p2 }
  0x71   : > { %534 = shalt.err (!%p531_p8)
}
  0x72   : > { %s600_s29 = smov 128   ;;  %s601_s19 = smov 8  }
  0x73   : > { %378 = dma.vmem_to_hbm [thread:$0]  (%p715_p11), %s797_s21, 1024, %s802_s7, %s239_s4, %s600_s29, %s600_s29, %s601_s19  }
  0x74 PF: > { %p395_p12 = scmp.ge.s32.totalorder %s593_s14, 2  ;;  %s269_s17 = sand.u32 1, %s573_s9  }
  0x75   : > { %p870_p10 = scmp.ne.s32.totalorder %s860_s20, 0  ;;  %s270_s12 = scalar_lea.sflag [#allocation4], %s269_s17 }
  0x77   : > { %p389_p0 = pnand %p395_p12, %p870_p10 }
  0x79   : > { %568 = dma.done.wait (!%p389_p0), %s270_s12, 1024  }
  0x7a   : > { %570 = vsyncadd (!%p389_p0), %s270_s12, 4294966272  ;;  %s19_s14 = sadd.s32 1, %s593_s14   ;;  %s871_s9 = smov %s577_s10 }
  0x7b   : > { %p16_p5 = scmp.ge.s32.totalorder %s19_s14, 6   ;;  %s872_s10 = smov %s581_s11 }
  0x7c   : > { %s873_s11 = smov %s724_s28  ;;  %s874_s12 = smov %s589_s13 }
  0x7d   : > { %s875_s13 = smov %s877_s25  ;;  %18 = sbr.rel (!%p16_p5) target bundleno = 7 (0x7), region = 78 }
  0x84   :  { %275 = vsyncpa [#allocation3], 1 }
  0x85   :  { %277 = vsyncpa [#allocation3 + $0x1], 1 }
  0x86   :  { %278 = vsyncpa [#allocation6], 1 }
  0x87   :  { %279 = vsyncpa [#allocation4], 1 }
  0x88   :  { %281 = vsyncpa [#allocation4 + $0x1], 1 }

</bundles_post_ra>
